<compile_context>
chip_gen: v7x
topology: tpu7x:2x2x1
jax: 0.10.0
libtpu: 0.0.40
codegen_flags: <defaults>
</compile_context>

<pallas_src>
import jax
import jax.numpy as jnp
from jax.experimental import pallas as pl
from jax.experimental.pallas import tpu as pltpu

LEAKY_SLOPE = 0.01        # PyTorch nn.LeakyReLU default negative_slope
_HIDDEN_ALIGN = 128       # lane alignment for the hidden feature dims
_WHOLE_BATCH_MAX = 1024   # up to this many rows: whole batch = one block/net
_TB_LARGE = 512           # batch tile for very large replay batches


def _leaky_relu(x):
    return jnp.where(x >= 0, x, LEAKY_SLOPE * x)


def _round_up(n, m):
    return ((n + m - 1) // m) * m


def _ddqn_kernel(x_ref, w1_ref, b1_ref, w2_ref, b2_ref, w3_ref, b3_ref, out_ref):
    """Fused 3-layer MLP forward for one (model, batch-tile) grid point.

    x_ref:  (TB, state_dim)
    w1_ref: (state_dim, Hp)   b1_ref: (1, Hp)
    w2_ref: (Hp, Hp)          b2_ref: (1, Hp)
    w3_ref: (Hp, action_dim)  b3_ref: (1, action_dim)
    out_ref: (TB, action_dim)

    Zero-padded hidden lanes stay exactly zero through LeakyReLU (their bias
    entries are zero), so padding never perturbs the real outputs.
    """
    x = x_ref[...]

    h1 = jnp.dot(x, w1_ref[...], preferred_element_type=jnp.float32) + b1_ref[...]
    h1 = _leaky_relu(h1)

    h2 = jnp.dot(h1, w2_ref[...], preferred_element_type=jnp.float32) + b2_ref[...]
    h2 = _leaky_relu(h2)

    q = jnp.dot(h2, w3_ref[...], preferred_element_type=jnp.float32) + b3_ref[...]
    out_ref[...] = q.astype(out_ref.dtype)


@jax.jit
def ddqn_forward_both(x, stacked):
    """Evaluate online AND target nets in one pallas_call.

    x:       (batch, state_dim) float32
    stacked: tuple of 6 arrays with leading model axis of size 2:
             w1:(2,S,Hp) b1:(2,1,Hp) w2:(2,Hp,Hp) b2:(2,1,Hp)
             w3:(2,Hp,A) b3:(2,1,A)
    returns: (2, batch, action_dim)   [0]=online, [1]=target
    """
    w1, b1, w2, b2, w3, b3 = stacked
    batch, state_dim = x.shape
    action_dim = w3.shape[2]

    # Batch tiling: whole batch as a single block per net (grid effectively
    # (2,)) unless the replay batch is huge, in which case use 512-row tiles.
    # Either way VMEM usage stays <1 MiB, far under every generation's limit
    # (including v7x's 64 MiB), so no vmem_limit override is needed.
    if batch <= _WHOLE_BATCH_MAX:
        tb = batch
        nb = 1
        xp = x                      # no padding, no extra HBM round trip
        padded_batch = batch
    else:
        tb = _TB_LARGE
        padded_batch = _round_up(batch, tb)
        nb = padded_batch // tb
        xp = jnp.pad(x, ((0, padded_batch - batch), (0, 0)))

    # Weights/biases: full-extent blocks, model axis squeezed; block index
    # only depends on the OUTER model grid axis so they stay VMEM-resident
    # across the inner batch-tile loop.
    def w_spec(a):
        return pl.BlockSpec((None,) + a.shape[1:], lambda m, b: (m, 0, 0))

    out = pl.pallas_call(
        _ddqn_kernel,
        out_shape=jax.ShapeDtypeStruct((2, padded_batch, action_dim), jnp.float32),
        # (model, batch_tile); for batch <= 1024 this is (2, 1) == 2 grid steps.
        grid=(2, nb),
        in_specs=[
            pl.BlockSpec((tb, state_dim), lambda m, b: (b, 0)),
            w_spec(w1), w_spec(b1),
            w_spec(w2), w_spec(b2),
            w_spec(w3), w_spec(b3),
        ],
        out_specs=pl.BlockSpec((None, tb, action_dim), lambda m, b: (m, b, 0)),
        compiler_params=pltpu.CompilerParams(
            # Every grid point writes a distinct output block -> fully parallel.
            # On v7x the outer 2-net axis shards one net per TensorCore;
            # v5e/v6e simply run the (at most few) steps sequentially.
            dimension_semantics=("parallel", "parallel"),
        ),
    )(xp, w1, b1, w2, b2, w3, b3)

    if padded_batch != batch:
        out = out[:, :batch, :]
    return out


def init_linear(key, in_features, out_features):
    """Deterministic init mimicking PyTorch nn.Linear (uniform +/- 1/sqrt(in))."""
    kw, kb = jax.random.split(key)
    bound = 1.0 / jnp.sqrt(jnp.float32(in_features))
    w = jax.random.uniform(kw, (in_features, out_features), jnp.float32, -bound, bound)
    b = jax.random.uniform(kb, (1, out_features), jnp.float32, -bound, bound)
    return w, b


def _stack_and_pad(online, target):
    """Stack online/target params along a new model axis.

    Only the hidden dimension is padded (to a multiple of 128) so the two
    inner matmuls are lane-dense; the state and action dims are left at their
    true sizes (full-extent BlockSpec dims), avoiding padded DMA/stores.
    """
    w1o, _, _, _, w3o, _ = online
    hidden_dim = w1o.shape[1]
    hp = _round_up(hidden_dim, _HIDDEN_ALIGN)

    def pack(p):
        w1, b1, w2, b2, w3, b3 = p
        dh = hp - hidden_dim
        return (
            jnp.pad(w1, ((0, 0), (0, dh))),          # (S, Hp)
            jnp.pad(b1, ((0, 0), (0, dh))),          # (1, Hp)
            jnp.pad(w2, ((0, dh), (0, dh))),         # (Hp, Hp)
            jnp.pad(b2, ((0, 0), (0, dh))),          # (1, Hp)
            jnp.pad(w3, ((0, dh), (0, 0))),          # (Hp, A)
            b3,                                      # (1, A)
        )

    po = pack(online)
    pt = pack(target)
    return tuple(jnp.stack([a, b], axis=0) for a, b in zip(po, pt))


class DDQNPallas:
    """Mirror of the PyTorch DDQN: online net + frozen deepcopy target net."""

    def __init__(self, action_dim, state_dim, hidden_dim, key):
        k1, k2, k3 = jax.random.split(key, 3)
        w1, b1 = init_linear(k1, state_dim, hidden_dim)
        w2, b2 = init_linear(k2, hidden_dim, hidden_dim)
        w3, b3 = init_linear(k3, hidden_dim, action_dim)
        self.online = (w1, b1, w2, b2, w3, b3)
        # target = copy.deepcopy(online): identical parameters (frozen here)
        self.target = tuple(jnp.array(p) for p in self.online)
        self.action_dim = action_dim
        self._repack()

    # --- parameter management (keeps the fused kernel's packed copy fresh) ---
    def _repack(self):
        self.stacked = _stack_and_pad(self.online, self.target)

    def set_online_params(self, params):
        """Call after an optimizer step so the kernel sees fresh weights."""
        self.online = tuple(params)
        self._repack()

    def sync_target(self):
        """target <- deepcopy(online), as in the PyTorch training loop."""
        self.target = tuple(jnp.array(p) for p in self.online)
        self._repack()

    # --- forward ---
    def forward_both(self, x):
        """One fused launch: returns (q_online, q_target)."""
        q = ddqn_forward_both(x, self.stacked)
        return q[0], q[1]

    def forward(self, x, model):
        q_online, q_target = self.forward_both(x)
        if model == "online":
            return q_online
        elif model == "target":
            return q_target
        raise ValueError(f"unknown model: {model}")


def _reference_forward(x, params):
    w1, b1, w2, b2, w3, b3 = params
    h1 = _leaky_relu(x @ w1 + b1)
    h2 = _leaky_relu(h1 @ w2 + b2)
    return h2 @ w3 + b3


if __name__ == "__main__":
    key = jax.random.PRNGKey(0)
    k_params, k_x, k_mid, k_big = jax.random.split(key, 4)

    batch, state_dim, hidden_dim, action_dim = 2, 16, 32, 4
    net = DDQNPallas(action_dim, state_dim, hidden_dim, k_params)

    # --- tiny eval-size batch (whole-batch single block per net) ---
    x = jax.random.normal(k_x, (batch, state_dim), jnp.float32)
    q_online, q_target = net.forward_both(x)
    jax.block_until_ready(q_online)
    jax.block_until_ready(q_target)

    ref_online = _reference_forward(x, net.online)
    ref_target = _reference_forward(x, net.target)
    assert q_online.shape == (batch, action_dim)
    assert q_target.shape == (batch, action_dim)
    assert jnp.allclose(q_online, ref_online, atol=1e-4), "online mismatch"
    assert jnp.allclose(q_target, ref_target, atol=1e-4), "target mismatch"
    # target is a deepcopy of online, so outputs must coincide
    assert jnp.allclose(q_online, q_target, atol=1e-6)

    # forward(model=...) API path
    assert jnp.allclose(net.forward(x, "online"), q_online)
    assert jnp.allclose(net.forward(x, "target"), q_target)

    # --- replay-size batch (still whole-batch single block: 256 <= 1024) ---
    xm = jax.random.normal(k_mid, (256, state_dim), jnp.float32)
    qm_online, qm_target = net.forward_both(xm)
    jax.block_until_ready(qm_online)
    assert qm_online.shape == (256, action_dim)
    assert jnp.allclose(qm_online, _reference_forward(xm, net.online), atol=1e-4)
    assert jnp.allclose(qm_target, _reference_forward(xm, net.target), atol=1e-4)

    # --- very large batch to exercise the 512-row tiled path (+ batch pad) ---
    xb = jax.random.normal(k_big, (1537, state_dim), jnp.float32)
    qb_online, qb_target = net.forward_both(xb)
    jax.block_until_ready(qb_online)
    assert qb_online.shape == (1537, action_dim)
    assert jnp.allclose(qb_online, _reference_forward(xb, net.online), atol=1e-4)
    assert jnp.allclose(qb_target, _reference_forward(xb, net.target), atol=1e-4)

    # --- param-refresh path (correctness concern from review) ---
    new_params = tuple(p * 1.5 for p in net.online)
    net.set_online_params(new_params)
    q2_online, q2_target = net.forward_both(x)
    jax.block_until_ready(q2_online)
    assert jnp.allclose(q2_online, _reference_forward(x, net.online), atol=1e-4)
    assert jnp.allclose(q2_target, _reference_forward(x, net.target), atol=1e-4)
    net.sync_target()
    q3_online, q3_target = net.forward_both(x)
    jax.block_until_ready(q3_online)
    assert jnp.allclose(q3_online, q3_target, atol=1e-6)

    print("KERNEL_OK")
</pallas_src>

<mosaic_0001>
module attributes {stable_mosaic.version = 11 : i64} {
  func.func @_ddqn_kernel(%arg0: i32, %arg1: i32, %arg2: memref<2x16xf32, #tpu.memory_space<vmem>>, %arg3: memref<1x16x128xf32, #tpu.memory_space<vmem>>, %arg4: memref<1x1x128xf32, #tpu.memory_space<vmem>>, %arg5: memref<1x128x128xf32, #tpu.memory_space<vmem>>, %arg6: memref<1x1x128xf32, #tpu.memory_space<vmem>>, %arg7: memref<1x128x4xf32, #tpu.memory_space<vmem>>, %arg8: memref<1x1x4xf32, #tpu.memory_space<vmem>>, %arg9: memref<1x2x4xf32, #tpu.memory_space<vmem>>) attributes {dimension_semantics = [#tpu.dimension_semantics<parallel>, #tpu.dimension_semantics<parallel>], iteration_bounds = array<i64: 2, 1>, scalar_prefetch = 0 : i64, scratch_operands = 0 : i64, tpu.core_type = #tpu.core_type<tc>, window_params = [{transform_indices = @transform_0, window_bounds = array<i64: 2, 16>}, {transform_indices = @transform_1, window_bounds = array<i64: 1, 16, 128>}, {transform_indices = @transform_2, window_bounds = array<i64: 1, 1, 128>}, {transform_indices = @transform_3, window_bounds = array<i64: 1, 128, 128>}, {transform_indices = @transform_4, window_bounds = array<i64: 1, 1, 128>}, {transform_indices = @transform_5, window_bounds = array<i64: 1, 128, 4>}, {transform_indices = @transform_6, window_bounds = array<i64: 1, 1, 4>}, {transform_indices = @transform_7, window_bounds = array<i64: 1, 2, 4>}]} {
    %c0 = arith.constant 0 : index
    %c0_0 = arith.constant 0 : index
    %0 = vector.load %arg2[%c0, %c0_0] : memref<2x16xf32, #tpu.memory_space<vmem>>, vector<2x16xf32>
    %c0_1 = arith.constant 0 : index
    %c0_2 = arith.constant 0 : index
    %c0_3 = arith.constant 0 : index
    %1 = vector.load %arg3[%c0_1, %c0_2, %c0_3] : memref<1x16x128xf32, #tpu.memory_space<vmem>>, vector<1x16x128xf32>
    %2 = vector.shape_cast %1 : vector<1x16x128xf32> to vector<16x128xf32>
    %cst = arith.constant dense<0.000000e+00> : vector<2x128xf32>
    %3 = tpu.matmul %0, %2, %cst {dimension_numbers = #tpu.dot_dimension_numbers<[1], [0], [0], [1], [0, 0, 1, 1], [], []>} : vector<2x16xf32>, vector<16x128xf32>, vector<2x128xf32> -> vector<2x128xf32>
    %c0_4 = arith.constant 0 : index
    %c0_5 = arith.constant 0 : index
    %c0_6 = arith.constant 0 : index
    %4 = vector.load %arg4[%c0_4, %c0_5, %c0_6] : memref<1x1x128xf32, #tpu.memory_space<vmem>>, vector<1x1x128xf32>
    %5 = vector.shape_cast %4 : vector<1x1x128xf32> to vector<1x128xf32>
    %6 = vector.broadcast %5 : vector<1x128xf32> to vector<2x128xf32>
    %7 = arith.addf %3, %6 : vector<2x128xf32>
    %cst_7 = arith.constant 0.000000e+00 : f32
    %8 = vector.broadcast %cst_7 : f32 to vector<2x128xf32>
    %9 = arith.cmpf oge, %7, %8 : vector<2x128xf32>
    %cst_8 = arith.constant 0.00999999977 : f32
    %10 = vector.broadcast %cst_8 : f32 to vector<2x128xf32>
    %11 = arith.mulf %10, %7 : vector<2x128xf32>
    %12 = arith.select %9, %7, %11 : vector<2x128xi1>, vector<2x128xf32>
    %c0_9 = arith.constant 0 : index
    %c0_10 = arith.constant 0 : index
    %c0_11 = arith.constant 0 : index
    %13 = vector.load %arg5[%c0_9, %c0_10, %c0_11] : memref<1x128x128xf32, #tpu.memory_space<vmem>>, vector<1x128x128xf32>
    %14 = vector.shape_cast %13 : vector<1x128x128xf32> to vector<128x128xf32>
    %cst_12 = arith.constant dense<0.000000e+00> : vector<2x128xf32>
    %15 = tpu.matmul %12, %14, %cst_12 {dimension_numbers = #tpu.dot_dimension_numbers<[1], [0], [0], [1], [0, 0, 1, 1], [], []>} : vector<2x128xf32>, vector<128x128xf32>, vector<2x128xf32> -> vector<2x128xf32>
    %c0_13 = arith.constant 0 : index
    %c0_14 = arith.constant 0 : index
    %c0_15 = arith.constant 0 : index
    %16 = vector.load %arg6[%c0_13, %c0_14, %c0_15] : memref<1x1x128xf32, #tpu.memory_space<vmem>>, vector<1x1x128xf32>
    %17 = vector.shape_cast %16 : vector<1x1x128xf32> to vector<1x128xf32>
    %18 = vector.broadcast %17 : vector<1x128xf32> to vector<2x128xf32>
    %19 = arith.addf %15, %18 : vector<2x128xf32>
    %cst_16 = arith.constant 0.000000e+00 : f32
    %20 = vector.broadcast %cst_16 : f32 to vector<2x128xf32>
    %21 = arith.cmpf oge, %19, %20 : vector<2x128xf32>
    %cst_17 = arith.constant 0.00999999977 : f32
    %22 = vector.broadcast %cst_17 : f32 to vector<2x128xf32>
    %23 = arith.mulf %22, %19 : vector<2x128xf32>
    %24 = arith.select %21, %19, %23 : vector<2x128xi1>, vector<2x128xf32>
    %c0_18 = arith.constant 0 : index
    %c0_19 = arith.constant 0 : index
    %c0_20 = arith.constant 0 : index
    %25 = vector.load %arg7[%c0_18, %c0_19, %c0_20] : memref<1x128x4xf32, #tpu.memory_space<vmem>>, vector<1x128x4xf32>
    %26 = vector.shape_cast %25 : vector<1x128x4xf32> to vector<128x4xf32>
    %cst_21 = arith.constant dense<0.000000e+00> : vector<2x4xf32>
    %27 = tpu.matmul %24, %26, %cst_21 {dimension_numbers = #tpu.dot_dimension_numbers<[1], [0], [0], [1], [0, 0, 1, 1], [], []>} : vector<2x128xf32>, vector<128x4xf32>, vector<2x4xf32> -> vector<2x4xf32>
    %c0_22 = arith.constant 0 : index
    %c0_23 = arith.constant 0 : index
    %c0_24 = arith.constant 0 : index
    %28 = vector.load %arg8[%c0_22, %c0_23, %c0_24] : memref<1x1x4xf32, #tpu.memory_space<vmem>>, vector<1x1x4xf32>
    %29 = vector.shape_cast %28 : vector<1x1x4xf32> to vector<1x4xf32>
    %30 = vector.broadcast %29 : vector<1x4xf32> to vector<2x4xf32>
    %31 = arith.addf %27, %30 : vector<2x4xf32>
    %c0_25 = arith.constant 0 : index
    %c0_26 = arith.constant 0 : index
    %c0_27 = arith.constant 0 : index
    %32 = vector.load %arg9[%c0_25, %c0_26, %c0_27] : memref<1x2x4xf32, #tpu.memory_space<vmem>>, vector<1x2x4xf32>
    %33 = vector.shape_cast %32 : vector<1x2x4xf32> to vector<2x4xf32>
    %34 = vector.shape_cast %31 : vector<2x4xf32> to vector<1x2x4xf32>
    tpu.vector_store %arg9[%c0_25, %c0_26, %c0_27], %34 {strides = array<i32>} : memref<1x2x4xf32, #tpu.memory_space<vmem>>, vector<1x2x4xf32>,
    return
  }
  func.func @transform_0(%arg0: i32, %arg1: i32) -> (i32, i32) {
    %c0_i32 = arith.constant 0 : i32
    %c0_i32_0 = arith.constant 0 : i32
    return %arg1, %c0_i32 : i32, i32
  }
  func.func @transform_1(%arg0: i32, %arg1: i32) -> (i32, i32, i32) {
    %c0_i32 = arith.constant 0 : i32
    %c0_i32_0 = arith.constant 0 : i32
    %c0_i32_1 = arith.constant 0 : i32
    return %arg0, %c0_i32, %c0_i32_0 : i32, i32, i32
  }
  func.func @transform_2(%arg0: i32, %arg1: i32) -> (i32, i32, i32) {
    %c0_i32 = arith.constant 0 : i32
    %c0_i32_0 = arith.constant 0 : i32
    %c0_i32_1 = arith.constant 0 : i32
    return %arg0, %c0_i32, %c0_i32_0 : i32, i32, i32
  }
  func.func @transform_3(%arg0: i32, %arg1: i32) -> (i32, i32, i32) {
    %c0_i32 = arith.constant 0 : i32
    %c0_i32_0 = arith.constant 0 : i32
    %c0_i32_1 = arith.constant 0 : i32
    return %arg0, %c0_i32, %c0_i32_0 : i32, i32, i32
  }
  func.func @transform_4(%arg0: i32, %arg1: i32) -> (i32, i32, i32) {
    %c0_i32 = arith.constant 0 : i32
    %c0_i32_0 = arith.constant 0 : i32
    %c0_i32_1 = arith.constant 0 : i32
    return %arg0, %c0_i32, %c0_i32_0 : i32, i32, i32
  }
  func.func @transform_5(%arg0: i32, %arg1: i32) -> (i32, i32, i32) {
    %c0_i32 = arith.constant 0 : i32
    %c0_i32_0 = arith.constant 0 : i32
    %c0_i32_1 = arith.constant 0 : i32
    return %arg0, %c0_i32, %c0_i32_0 : i32, i32, i32
  }
  func.func @transform_6(%arg0: i32, %arg1: i32) -> (i32, i32, i32) {
    %c0_i32 = arith.constant 0 : i32
    %c0_i32_0 = arith.constant 0 : i32
    %c0_i32_1 = arith.constant 0 : i32
    return %arg0, %c0_i32, %c0_i32_0 : i32, i32, i32
  }
  func.func @transform_7(%arg0: i32, %arg1: i32) -> (i32, i32, i32) {
    %c0_i32 = arith.constant 0 : i32
    %c0_i32_0 = arith.constant 0 : i32
    return %arg0, %arg1, %c0_i32 : i32, i32, i32
  }
}

</mosaic_0001>

<bundles_post_ra>
// kernel: ddqn_forward_both.1
= control target key start
LH: loop header
LB: loop body
LE: loop exit
PB: predicated region body
PF: predicated region fallthrough
CT: control target
= control target key end

     0   :  { %12 = vsyncpa [#allocation3], 0  ;;  %s1527_s0 = inlined_call_operand.vmem [shape: f32[2,16], index: 0, kind: input, shape index: {}]   ;;  %s1528_s1 = inlined_call_operand.hbm [shape: f32[2,16,128], index: 1, kind: input, shape index: {}]   ;;  %s1529_s2 = inlined_call_operand.vmem [shape: f32[2,1,128], index: 2, kind: input, shape index: {}]   ;;  %s1530_s3 = inlined_call_operand.vmem [shape: f32[2,128,128], index: 3, kind: input, shape index: {}]   ;;  %s1531_s4 = inlined_call_operand.vmem [shape: f32[2,1,128], index: 4, kind: input, shape index: {}]   ;;  %s1532_s5 = inlined_call_operand.vmem [shape: f32[2,128,4], index: 5, kind: input, shape index: {}]   ;;  %s1533_s6 = inlined_call_operand.vmem [shape: f32[2,1,4], index: 6, kind: input, shape index: {}]   ;;  %s1534_s7 = inlined_call_operand.hbm [shape: f32[2,2,4], index: 7, kind: output, shape index: {}]  }
   0x1   :  { %14 = vsyncpa [#allocation3 + $0x1], 0 }
   0x2   :  { %15 = vsyncpa [#allocation4], 0 }
   0x3   :  { %17 = vsyncpa [#allocation4 + $0x1], 0  ;;  %s1267_s24 = smov 0   ;;  %s1269_s25 = smov 0  }
   0x4   :  { %s1271_s26 = smov 0   ;;  %s1273_s27 = smov 0  }
   0x5   :  { %s1275_s28 = smov 0   ;;  %s1277_s29 = smov 0  }
   0x6 LB: > { %s848_s30 = sadd.s32 4294967295, %s1218_s29   ;;  %s849_s8 = sadd.s32 4294967294, %s1218_s29   ;;  %s1218_s29 = sphi %s1277_s29, %s23_s29   ;;  %s1214_s28 = sphi %s1275_s28, %s1549_s28   ;;  %s1210_s27 = sphi %s1273_s27, %s1548_s27   ;;  %s1206_s26 = sphi %s1271_s26, %s1547_s26   ;;  %s1202_s25 = sphi %s1269_s25, %s1546_s25   ;;  %s1198_s24 = sphi %s1267_s24, %s1545_s24  }
   0x7   : > { %s35_s9 = sadd.s32 1, %s1214_s28  ;;  %s68_s10 = sadd.s32 1, %s1206_s26 }
   0x8   : > { %p37_p0 = scmp.ge.s32.totalorder %s35_s9, 2  ;;  %p75_p1 = scmp.ne.s32.totalorder %s1206_s26, %s1202_s25 }
   0x9   : > { %p76_p2 = scmp.eq.s32.totalorder %s1218_s29, 0  ;;  %p81_p3 = scmp.ne.s32.totalorder %s1202_s25, %s1198_s24 }
   0xa   : > { %s1551_s9 = smov (%p37_p0, %s35_s9), 0  ;;  %p82_p5 = scmp.eq.s32.totalorder %s848_s30, 0 }
   0xb   : > { %p1308_p4 = por %p76_p2, %p75_p1  ;;  %s65_s12 = ssub.s32 %s1214_s28, %s1551_s9 }
   0xc   : > { %p237_p6 = scmp.eq.s32.totalorder %s848_s30, 1  ;;  %p66_p7 = scmp.eq.s32.totalorder %s65_s12, 0 }
   0xd   : > { %p1314_p8 = por %p82_p5, %p81_p3  ;;  %p243_p10 = scmp.eq.s32.totalorder %s849_s8, 1 }
   0xe   : > { %p1318_p9 = por %p237_p6, %p75_p1  ;;  %p1051_p13 = scmp.lt.s32.totalorder %s1218_s29, 2 }
   0xf   : > { %s1323_s15 = scalar_select %p66_p7, %s1206_s26, %s68_s10  }
  0x10   : > { %s1538_s14 = scalar_select %p1318_p9, 1, 0 }
  0x11   : > { %p1325_p11 = por %p243_p10, %p81_p3  ;;  %s270_s17 = sand.u32 1, %s1206_s26  }
  0x12   : > { %s853_s18 = sshll.u32 %s270_s17, 4  ;;  %s871_s19 = sshll.u32 %s1214_s28, 8 }
  0x13   : > { %s1539_s16 = scalar_select %p1325_p11, 1, 0 }
  0x14   : > { %s1336_s22 = scalar_lea.hbm %s1528_s1, %s871_s19  ;;  %s274_s23 = scalar_lea.vmem [#allocation2], %s853_s18 }
  0x15   : > { %s281_s30 = sshll.u32 %s274_s23, 4  ;;  %p1342_p0 = pnand %p1051_p13, %p1308_p4  ;;  %s1338_s30 = int_to_ptr.vmem [resolvable:$true] %s281_s30 }
  0x16   : > { %s1347_s10 = scalar_lea.sflag [#allocation3], %s270_s17  ;;  %s1106_s12 = scalar_lea.hbm %s1336_s22, 256 }
  0x17   : > { %p1107_p2 = scmp.ne.s32.totalorder %s1336_s22, %s1106_s12  ;;  %p1108_p3 = pneg %p1342_p0 }
  0x18   : > { %s1111_s11 = scalar_lea.hbm %s1528_s1, 512  ;;  %p1112_p4 = scmp.lt.u32.totalorder %s1336_s22, %s1528_s1 }
  0x19   : > { %p1109_p5 = pnand %p1108_p3, %p1107_p2  ;;  %p1113_p7 = scmp.lt.u32.totalorder %s1111_s11, %s1106_s12 }
  0x1a   : > { %p1115_p13 = scmp.lt.u32.totalorder %s1106_s12, %s1336_s22 }
  0x1b   : > { %p1110_p6 = pneg %p1109_p5  ;;  %p1114_p10 = por %p1113_p7, %p1112_p4 }
  0x1d   : > { %p1116_p12 = por %p1115_p13, %p1114_p10 }
  0x1f   : > { %p1117_p1 = pnand %p1116_p12, %p1110_p6 }
  0x21   : > { %1120 = shalt.err (!%p1117_p1)
}
  0x22   : > { %s1121_s17 = scalar_lea.vmem %s1338_s30, 256  ;;  %s1220_s23 = smov [#allocation2]  }
  0x23   : > { %p1122_p2 = scmp.ne.s32.totalorder %s1338_s30, %s1121_s17  ;;  %s1126_s18 = sshll.u32 %s1220_s23, 4  ;;  %s1127_s18 = int_to_ptr.vmem [resolvable:$false] %s1126_s18 }
  0x24   : > { %s1128_s19 = scalar_lea.vmem %s1127_s18, 512  ;;  %p1129_p9 = scmp.lt.s32.totalorder %s1338_s30, %s1127_s18 }
  0x25   : > { %p1124_p5 = pnand %p1122_p2, %p1108_p3  ;;  %p1130_p4 = scmp.lt.s32.totalorder %s1128_s19, %s1121_s17 }
  0x27   : > { %p1125_p11 = pneg %p1124_p5  ;;  %p1131_p7 = por %p1130_p4, %p1129_p9 }
  0x29   : > { %p1132_p10 = pnand %p1131_p7, %p1125_p11 }
  0x2b   : > { %1135 = shalt.err (!%p1132_p10)
}
  0x2c   : > { %s1221_s12 = smov 128   ;;  %s1222_s11 = smov 8  }
  0x2d   : > { %1046 = dma.hbm_to_vmem [thread:$0]  (!%p1342_p0), %s1336_s22, 256, %s1338_s30, %s1347_s10, %s1221_s12, %s1221_s12, %s1222_s11  }
  0x2e   : > { %p323_p12 = scmp.lt.s32.totalorder %s1218_s29, 3  ;;  %p1541_p1 = scmp.ge.s32.totalorder %s1218_s29, 1 }
  0x30   : > { %p324_p3 = pnand %p1541_p1, %p323_p12 }
  0x31   : > { %s1379_s20 = sand.u32 (!%p324_p3), 1, %s1202_s25  }
  0x32   : > { %327 = sbr.rel (%p324_p3) target bundleno = 727 (0x2d7), region = 48  ;;  %s857_s21 = sshll.u32 (!%p324_p3), %s1379_s20, 4 }
  0x33   : > { %s330_s17 = scalar_lea.sflag (!%p324_p3), [#allocation3], %s1379_s20  ;;  %s333_s23 = scalar_lea.vmem (!%p324_p3), [#allocation2], %s857_s21 }
  0x39   : > { %1189 = dma.done.wait (%p1314_p8), %s330_s17, 256  }
  0x3a   : > { %1191 = vsyncadd (%p1314_p8), %s330_s17, 4294967040  ;;  %p391_p9 = scmp.lt.s32.totalorder %s1210_s27, 1  ;;  %v1223_v0 = vmov 0.0|0.0   ;;  %vm1224_vm0 = vmmov 0   ;;  %v1225_v1 = vmov 0.0   ;;  %v411_v2 = vld [vmem:[%s333_s23] sm:$0xff] }
  0x3b   : > { %988 = vmatprep.subr.bf16.mxu0 %v1223_v0  ;;  %915 = vmatprep.mubr.msk.f32.mxu0 %vm1224_vm0, %v1225_v1  ;;  %v412_v3 = vld [vmem:[%s333_s23 + $0x8] sm:$0xff]  ;;  %v410_v10 = vld [vmem:[%s1527_s0] sm:$0x3]  ;;  %vm420_vm1 = vcmask 130048   ;;  %s858_s18 = sshll.u32 %s1379_s20, 1  ;;  %vm686_vm4 = vcmask 25600  }
  0x3c   : > { %991 = vmatprep.subr.bf16.mxu1 %v1223_v0  ;;  %s1392_s22 = scalar_select %p391_p9, %s1210_s27, 1  ;;  %950 = vmatprep.mubr.msk.f32.mxu1 %vm1224_vm0, %v1225_v1  ;;  %v989_v4 = vpack.c.bf16 %v412_v3, %v411_v2 }
  0x3d   : > { %s386_s17 = scalar_lea.vmem [#allocation5], %s858_s18  ;;  %p1542_p11 = scmp.ne.s32.totalorder %s1538_s14, 0 }
  0x3e   : > { %s872_s13 = sshll.u32 %s1392_s22, 7  ;;  %990 = vmatpush3.bf16.msra.mxu0 %v989_v4  ;;  %s409_s11 = scalar_lea.vmem %s1533_s6, %s1392_s22 }
  0x3f   : > { %s1401_s10 = scalar_lea.vmem %s1530_s3, %s872_s13  ;;  %1015 = vmatprep.subr.bf16.mxu0 %v1223_v0  ;;  %s1436_s21 = scalar_lea.vmem %s1532_s5, %s872_s13  ;;  %v866_v2 = vld [vmem:[%s409_s11] ss:$0 sm:$0xff] }
  0x40   : > { %v497_v5 = vld [vmem:[%s1401_s10] sm:$0xff]  ;;  %v498_v6 = vld [vmem:[%s1401_s10 + $0x8] sm:$0xff]  ;;  %v499_v7 = vld [vmem:[%s1401_s10 + $0x10] sm:$0xff]  ;;  %s393_s13 = scalar_lea.vmem %s1529_s2, %s1392_s22  ;;  %s703_s23 = sshll.u32 %s386_s17, 4  ;;  %s1480_s23 = int_to_ptr.vmem [resolvable:$true] %s703_s23 }
  0x41   : > { %v992_v8 = vpack.c.bf16 %v498_v6, %v497_v5  ;;  %v500_v9 = vld [vmem:[%s1401_s10 + $0x18] sm:$0xff]  ;;  %v501_v12 = vld [vmem:[%s1401_s10 + $0x20] sm:$0xff]  ;;  %v502_v13 = vld [vmem:[%s1401_s10 + $0x28] sm:$0xff]  ;;  %916 = vmatmul.mubr.msk.f32.vlgmr.msra.gmra.mrb[0].mxu0 %vm420_vm1, %v410_v10 }
  0x42   : > { %v995_v11 = vpack.c.bf16 %v500_v9, %v499_v7  ;;  %985 = vmatprep.mubr.msk.f32.mxu0 %vm1224_vm0, %v1225_v1  ;;  %v998_v14 = vpack.c.bf16 %v502_v13, %v501_v12  ;;  %v503_v15 = vld [vmem:[%s1401_s10 + $0x30] sm:$0xff]  ;;  %v504_v16 = vld [vmem:[%s1401_s10 + $0x38] sm:$0xff]  ;;  %v505_v18 = vld [vmem:[%s1401_s10 + $0x40] sm:$0xff] }
  0x43   : > { %993 = vmatpush3.bf16.msra.mxu1 %v992_v8  ;;  %v1001_v17 = vpack.c.bf16 %v504_v16, %v503_v15  ;;  %v506_v19 = vld [vmem:[%s1401_s10 + $0x48] sm:$0xff]  ;;  %v507_v21 = vld [vmem:[%s1401_s10 + $0x50] sm:$0xff]  ;;  %v508_v22 = vld [vmem:[%s1401_s10 + $0x58] sm:$0xff] }
  0x44   : > { %994 = vmatprep.subr.bf16.mxu1 %v1223_v0  ;;  %v1004_v20 = vpack.c.bf16 %v506_v19, %v505_v18  ;;  %v1007_v23 = vpack.c.bf16 %v508_v22, %v507_v21  ;;  %v509_v24 = vld [vmem:[%s1401_s10 + $0x60] sm:$0xff]  ;;  %v510_v25 = vld [vmem:[%s1401_s10 + $0x68] sm:$0xff]  ;;  %v511_v27 = vld [vmem:[%s1401_s10 + $0x70] sm:$0xff] }
  0x45   : > { %v1010_v26 = vpack.c.bf16 %v510_v25, %v509_v24  ;;  %v512_v28 = vld [vmem:[%s1401_s10 + $0x78] sm:$0xff]  ;;  %v593_v30 = vld [vmem:[%s1436_s21] sm:$0xff]  ;;  %v594_v31 = vld [vmem:[%s1436_s21 + $0x8] sm:$0xff]  ;;  %s401_s10 = scalar_lea.vmem %s1531_s4, %s1392_s22  ;;  %s689_s22 = scalar_lea.sflag [#allocation4], %s1379_s20 }
  0x46   : > { %v1013_v29 = vpack.c.bf16 %v512_v28, %v511_v27  ;;  %v595_v32 = vld [vmem:[%s1436_s21 + $0x10] sm:$0xff]  ;;  %v1016_v33 = vpack.c.bf16 %v594_v31, %v593_v30  ;;  %v596_v34 = vld [vmem:[%s1436_s21 + $0x18] sm:$0xff]  ;;  %v597_v36 = vld [vmem:[%s1436_s21 + $0x20] sm:$0xff] }
  0x47   : > { %996 = vmatpush3.bf16.msra.mxu1 %v995_v11  ;;  %v1019_v35 = vpack.c.bf16 %v596_v34, %v595_v32  ;;  %v598_v37 = vld [vmem:[%s1436_s21 + $0x28] sm:$0xff]  ;;  %v599_v39 = vld [vmem:[%s1436_s21 + $0x30] sm:$0xff]  ;;  %v600_v40 = vld [vmem:[%s1436_s21 + $0x38] sm:$0xff] }
  0x48   : > { %997 = vmatprep.subr.bf16.mxu1 %v1223_v0  ;;  %1017 = vmatpush3.bf16.msra.mxu0 %v1016_v33  ;;  %v1022_v38 = vpack.c.bf16 %v598_v37, %v597_v36  ;;  %v1025_v41 = vpack.c.bf16 %v600_v40, %v599_v39  ;;  %v601_v42 = vld [vmem:[%s1436_s21 + $0x40] sm:$0xff]  ;;  %v602_v43 = vld [vmem:[%s1436_s21 + $0x48] sm:$0xff]  ;;  %v603_v45 = vld [vmem:[%s1436_s21 + $0x50] sm:$0xff] }
  0x49   : > { %1018 = vmatprep.subr.bf16.mxu0 %v1223_v0  ;;  %v1028_v44 = vpack.c.bf16 %v602_v43, %v601_v42  ;;  %v604_v46 = vld [vmem:[%s1436_s21 + $0x58] sm:$0xff]  ;;  %v605_v48 = vld [vmem:[%s1436_s21 + $0x60] sm:$0xff]  ;;  %v606_v49 = vld [vmem:[%s1436_s21 + $0x68] sm:$0xff] }
  0x4a   : > { %v1031_v47 = vpack.c.bf16 %v604_v46, %v603_v45  ;;  %v1034_v50 = vpack.c.bf16 %v606_v49, %v605_v48  ;;  %v863_v51 = vld [vmem:[%s393_s13] ss:$0 sm:$0xff]  ;;  %v607_v57 = vld [vmem:[%s1436_s21 + $0x70] sm:$0xff]  ;;  %v608_v58 = vld [vmem:[%s1436_s21 + $0x78] sm:$0xff]  ;;  %s868_s21 = sshll.u32 %s1210_s27, 5  ;;  %s1226_s27 = smov [#allocation5]  }
  0x4b   : > { %999 = vmatpush3.bf16.msra.mxu1 %v998_v14  ;;  %v1037_v59 = vpack.c.bf16 %v608_v58, %v607_v57  ;;  %v865_v60 = vld [vmem:[%s401_s10] ss:$0 sm:$0xff]  ;;  %s1478_s8 = scalar_lea.hbm %s1534_s7, %s868_s21  ;;  %s1136_s10 = scalar_lea.vmem %s1480_s23, 32 }
  0x4c   : > { %1000 = vmatprep.subr.bf16.mxu1 %v1223_v0  ;;  %1020 = vmatpush3.bf16.msra.mxu0 %v1019_v35  ;;  %p1137_p8 = scmp.ne.s32.totalorder %s1480_s23, %s1136_s10  ;;  %s1140_s18 = sshll.u32 %s1226_s27, 4  ;;  %s1141_s18 = int_to_ptr.vmem [resolvable:$false] %s1140_s18 }
  0x4d   : > { %1021 = vmatprep.subr.bf16.mxu0 %v1223_v0  ;;  %s1142_s19 = scalar_lea.vmem %s1141_s18, 64  ;;  %p1143_p13 = scmp.lt.s32.totalorder %s1480_s23, %s1141_s18 }
  0x4e   : > { %p1138_p0 = pnand %p1137_p8, %p1542_p11  ;;  %p1144_p2 = scmp.lt.s32.totalorder %s1142_s19, %s1136_s10 }
  0x4f   : > { %1002 = vmatpush3.bf16.msra.mxu1 %v1001_v17 }
  0x50   : > { %1003 = vmatprep.subr.bf16.mxu1 %v1223_v0  ;;  %1023 = vmatpush3.bf16.msra.mxu0 %v1022_v38  ;;  %p1139_p6 = pneg %p1138_p0  ;;  %p1145_p5 = por %p1144_p2, %p1143_p13 }
  0x51   : > { %1024 = vmatprep.subr.bf16.mxu0 %v1223_v0 }
  0x52   : > { %p1146_p4 = pnand %p1145_p5, %p1139_p6 }
  0x53   : > { %1005 = vmatpush3.bf16.msra.mxu1 %v1004_v20 }
  0x54   : > { %1006 = vmatprep.subr.bf16.mxu1 %v1223_v0  ;;  %1026 = vmatpush3.bf16.msra.mxu0 %v1025_v41 }
  0x55   : > { %1027 = vmatprep.subr.bf16.mxu0 %v1223_v0 }
  0x57   : > { %1008 = vmatpush3.bf16.msra.mxu1 %v1007_v23 }
  0x58   : > { %1009 = vmatprep.subr.bf16.mxu1 %v1223_v0  ;;  %1029 = vmatpush3.bf16.msra.mxu0 %v1028_v44 }
  0x59   : > { %1030 = vmatprep.subr.bf16.mxu0 %v1223_v0 }
  0x5b   : > { %1011 = vmatpush3.bf16.msra.mxu1 %v1010_v26 }
  0x5c   : > { %1012 = vmatprep.subr.bf16.mxu1 %v1223_v0  ;;  %1032 = vmatpush3.bf16.msra.mxu0 %v1031_v47 }
  0x5d   : > { %1033 = vmatprep.subr.bf16.mxu0 %v1223_v0 }
  0x5f   : > { %1014 = vmatpush3.bf16.msra.mxu1 %v1013_v29 }
  0x60   : > { %1035 = vmatpush3.bf16.msra.mxu0 %v1034_v50 }
  0x61   : > { %1036 = vmatprep.subr.bf16.mxu0 %v1223_v0 }
  0x64   : > { %1038 = vmatpush3.bf16.msra.mxu0 %v1037_v59 }
 0x114   : > { %v490_v52 = vpop.f32.mrb[0].mxu0 }
 0x115   : > { %v491_v53 = vadd.f32 %v863_v51, %v490_v52  ;;  %v917_v54 = vpop.f32.mrb[1].mxu0 }
 0x117   : > { %v495_v55 = vmul.f32 0.01, %v491_v53  ;;  %vm494_vm2 = vcmp.ge.f32.partialorder %v491_v53, 0.0 }
 0x119   : > { %v496_v56 = vsel %vm494_vm2, %v491_v53, %v495_v55 }
 0x11a   : > { %951 = vmatmul.mubr.f32.vlgmr.msra.gmra.mrb[0].mxu1 %v496_v56 }
 0x1ed   : > { %v586_v61 = vpop.f32.mrb[0].mxu1 }
 0x1ee   : > { %v587_v62 = vadd.f32 %v865_v60, %v586_v61  ;;  %v952_v63 = vpop.f32.mrb[1].mxu1 }
 0x1f0   : > { %vm590_vm3 = vcmp.ge.f32.partialorder %v587_v62, 0.0  ;;  %v591_v0 = vmul.f32 0.01, %v587_v62 }
 0x1f2   : > { %v592_v1 = vsel %vm590_vm3, %v587_v62, %v591_v0 }
 0x1f3   : > { %986 = vmatmul.mubr.f32.vlgmr.msra.gmra.mrb[2].mxu0 %v592_v1 }
 0x2c6   : > { %v682_v3 = vpop.f32.mrb[2].mxu0 }
 0x2c7   : > { %v683_v4 = vadd.f32 %v866_v2, %v682_v3  ;;  %v987_v5 = vpop.f32.mrb[3].mxu0 }
 0x2c9   : > { %687 = vst.msk [vmem:[%s386_s17] sm:$0x3] %vm686_vm4, %v683_v4 }
 0x2ca   : > { %1149 = shalt.err (!%p1146_p4)
}
 0x2cb   : > { %s1150_s20 = scalar_lea.hbm %s1478_s8, 32  ;;  %s1154_s21 = scalar_lea.hbm %s1534_s7, 64 }
 0x2cc   : > { %p1151_p7 = scmp.ne.s32.totalorder %s1478_s8, %s1150_s20  ;;  %p1155_p1 = scmp.lt.u32.totalorder %s1478_s8, %s1534_s7 }
 0x2cd   : > { %p1156_p3 = scmp.lt.u32.totalorder %s1154_s21, %s1150_s20  ;;  %p1158_p8 = scmp.lt.u32.totalorder %s1150_s20, %s1478_s8 }
 0x2ce   : > { %p1152_p10 = pnand %p1151_p7, %p1542_p11 }
 0x2cf   : > { %p1157_p9 = por %p1156_p3, %p1155_p1 }
 0x2d0   : > { %p1153_p12 = pneg %p1152_p10 }
 0x2d1   : > { %p1159_p0 = por %p1158_p8, %p1157_p9 }
 0x2d3   : > { %p1160_p6 = pnand %p1159_p0, %p1153_p12 }
 0x2d5   : > { %1163 = shalt.err (!%p1160_p6)
}
 0x2d6   : > { %1041 = dma.vmem_to_hbm [thread:$0]  (%p1542_p11), %s1480_s23, 32, %s1478_s8, %s689_s22  }
 0x2d7 PF: > { %s715_s30 = sand.u32 1, %s1198_s24   ;;  %p1543_p13 = scmp.ne.s32.totalorder %s1539_s16, 0 }
 0x2d8   : > { %p1544_p2 = scmp.ge.s32.totalorder %s1218_s29, 2  ;;  %s716_s10 = scalar_lea.sflag [#allocation4], %s715_s30 }
 0x2da   : > { %p1048_p5 = pnand %p1544_p2, %p1543_p13 }
 0x2dc   : > { %1193 = dma.done.wait (!%p1048_p5), %s716_s10, 32  }
 0x2dd   : > { %1195 = vsyncadd (!%p1048_p5), %s716_s10, 4294967264  ;;  %s23_s29 = sadd.s32 1, %s1218_s29   ;;  %s1545_s24 = smov %s1202_s25 }
 0x2de   : > { %p20_p4 = scmp.ge.s32.totalorder %s23_s29, 4   ;;  %s1546_s25 = smov %s1206_s26 }
 0x2df   : > { %s1547_s26 = smov %s1323_s15  ;;  %s1548_s27 = smov %s1214_s28 }
 0x2e0   : > { %s1549_s28 = smov %s1551_s9  ;;  %22 = sbr.rel (!%p20_p4) target bundleno = 6 (0x6), region = 111 }
 0x2e7   :  { %721 = vsyncpa [#allocation3], 1 }
 0x2e8   :  { %723 = vsyncpa [#allocation3 + $0x1], 1 }
 0x2e9   :  { %724 = vsyncpa [#allocation4], 1 }
 0x2ea   :  { %726 = vsyncpa [#allocation4 + $0x1], 1 }

</bundles_post_ra>
